<compile_context>
chip_gen: v6e
topology: v6e:2x2x1
jax: 0.10.0
libtpu: 0.0.40
codegen_flags: <defaults>
</compile_context>

<pallas_src>
import jax
import jax.numpy as jnp
from jax.experimental import pallas as pl
from jax.experimental.pallas import tpu as pltpu


_LANES = 128
_TARGET_BLOCK_BYTES = 6 * 1024 * 1024   # per-block (of the wider dtype); ~24 MiB resident
_FAST_PATH_BYTES = 1 * 1024 * 1024      # below this, plain XLA elementwise wins
_MIN_SPLIT_BYTES = 2 * 1024 * 1024      # force >=2 grid blocks above this (v7x dual TC)


def _sublane_multiple(dtype) -> int:
    itemsize = jnp.dtype(dtype).itemsize
    if itemsize == 1:
        return 32
    if itemsize == 2:
        return 16
    return 8


def oper(x, func=None):
    """JAX/Pallas equivalent of Oper(func)(x).

    `func` is assumed to be purely ELEMENTWISE (shape preserving); anything
    else falls back to calling func directly.
    # TODO(synk): non-elementwise funcs would need their own layout-aware kernels.
    """
    # Identity short-circuit: Oper() with func=None is a no-op.
    if func is None:
        return x

    orig_shape = x.shape
    total = x.size
    in_dtype = x.dtype
    in_item = jnp.dtype(in_dtype).itemsize

    # Small-tensor / empty fast path: launch overhead dominates, let XLA fuse it.
    if total == 0 or total * in_item < _FAST_PATH_BYTES:
        return func(x)

    # Probe func for output dtype and to enforce the elementwise contract.
    probe = jax.ShapeDtypeStruct((_sublane_multiple(in_dtype), _LANES), in_dtype)
    out_abs = jax.eval_shape(func, probe)
    if out_abs.shape != probe.shape:
        # Not elementwise (axis semantics / shape change) -> plain JAX path.
        return func(x)
    out_dtype = out_abs.dtype
    out_item = jnp.dtype(out_dtype).itemsize
    max_item = max(in_item, out_item)
    sub_mult = max(_sublane_multiple(in_dtype), _sublane_multiple(out_dtype))

    # Lane-dense columns: prefer a width that divides total so there is no tail.
    cols = 512
    for c in (512, 256, 128):
        if total % c == 0:
            cols = c
            break

    bulk = (total // cols) * cols      # streamed through the kernel
    tail = total - bulk                # < cols elements, handled with plain jnp
    rows = bulk // cols

    x_flat = x.reshape(-1)
    x2d = (x_flat[:bulk] if tail else x_flat).reshape(rows, cols)

    # Tile sizing: ~_TARGET_BLOCK_BYTES of the wider dtype, sublane-aligned,
    # never larger than the slab itself (ragged last block is auto-masked).
    tile_rows = max(sub_mult, _TARGET_BLOCK_BYTES // (cols * max_item))
    tile_rows = (tile_rows // sub_mult) * sub_mult
    tile_rows = min(tile_rows, max(sub_mult, (rows // sub_mult) * sub_mult))

    # Keep >=2 parallel blocks for mid-sized tensors so both v7x TCs are busy.
    if tile_rows >= rows and rows * cols * max_item >= _MIN_SPLIT_BYTES:
        tile_rows = max(sub_mult, pl.cdiv(pl.cdiv(rows, 2), sub_mult) * sub_mult)

    grid = (pl.cdiv(rows, tile_rows),)

    cost = pl.CostEstimate(
        flops=rows * cols,
        transcendentals=0,
        bytes_accessed=rows * cols * (in_item + out_item),
    )

    def kernel(x_ref, o_ref):
        o_ref[...] = func(x_ref[...])

    out2d = pl.pallas_call(
        kernel,
        out_shape=jax.ShapeDtypeStruct((rows, cols), out_dtype),
        grid=grid,
        in_specs=[pl.BlockSpec((tile_rows, cols), lambda i: (i, 0))],
        out_specs=pl.BlockSpec((tile_rows, cols), lambda i: (i, 0)),
        compiler_params=pltpu.CompilerParams(
            dimension_semantics=("parallel",),  # elementwise: tiles are independent
        ),
        cost_estimate=cost,
    )(x2d)

    out_bulk = out2d.reshape(-1)
    if tail:
        out_tail = func(x_flat[bulk:])
        out_flat = jnp.concatenate([out_bulk, out_tail.astype(out_dtype)])
    else:
        out_flat = out_bulk
    return out_flat.reshape(orig_shape)


if __name__ == "__main__":
    key = jax.random.PRNGKey(0)
    k1, k2, k3 = jax.random.split(key, 3)

    # 1) Small NCHW input consistent with a conv-style module: (N, C, H, W).
    #    func=None -> pure identity; small func -> XLA fast path.
    x_small = jax.random.normal(k1, (2, 4, 16, 16), dtype=jnp.float32)
    y_id = oper(x_small, func=None)
    jax.block_until_ready(y_id)
    assert y_id.shape == x_small.shape and y_id.dtype == x_small.dtype
    assert bool(jnp.allclose(y_id, x_small))

    y_small = oper(x_small, func=lambda v: jnp.maximum(v, 0.0))
    jax.block_until_ready(y_small)
    assert bool(jnp.allclose(y_small, jnp.maximum(x_small, 0.0)))

    # 2) Larger activation tensor (2 MiB): streamed through the Pallas kernel,
    #    exact 512-wide slab, grid split into >= 2 parallel row blocks.
    x_big = jax.random.normal(k2, (4, 8, 128, 128), dtype=jnp.float32)
    y_big = oper(x_big, func=lambda v: jnp.maximum(v, 0.0))
    jax.block_until_ready(y_big)
    assert y_big.shape == x_big.shape and y_big.dtype == x_big.dtype
    assert bool(jnp.allclose(y_big, jnp.maximum(x_big, 0.0)))

    # 3) Ragged total (not a multiple of 128): bulk through the kernel with a
    #    masked partial last block, < 512-element tail handled with plain jnp.
    x_rag = jax.random.normal(k3, (3, 5, 129, 257), dtype=jnp.float32)
    y_rag = oper(x_rag, func=jnp.exp)
    jax.block_until_ready(y_rag)
    assert y_rag.shape == x_rag.shape
    assert bool(jnp.allclose(y_rag, jnp.exp(x_rag), rtol=1e-5, atol=1e-5))

    print("KERNEL_OK")
</pallas_src>

<mosaic_0001>
module attributes {stable_mosaic.version = 11 : i64} {
  func.func @kernel(%arg0: i32, %arg1: memref<512x512xf32, #tpu.memory_space<vmem>>, %arg2: memref<512x512xf32, #tpu.memory_space<vmem>>) attributes {dimension_semantics = [#tpu.dimension_semantics<parallel>], iteration_bounds = array<i64: 2>, scalar_prefetch = 0 : i64, scratch_operands = 0 : i64, tpu.core_type = #tpu.core_type<tc>, window_params = [{transform_indices = @transform_0, window_bounds = array<i64: 512, 512>}, {transform_indices = @transform_1, window_bounds = array<i64: 512, 512>}]} {
    %c0 = arith.constant 0 : index
    %c0_0 = arith.constant 0 : index
    %0 = vector.load %arg1[%c0, %c0_0] : memref<512x512xf32, #tpu.memory_space<vmem>>, vector<512x512xf32>
    %cst = arith.constant 0.000000e+00 : f32
    %1 = vector.broadcast %cst : f32 to vector<512x512xf32>
    %2 = arith.maximumf %0, %1 : vector<512x512xf32>
    %c0_1 = arith.constant 0 : index
    %c0_2 = arith.constant 0 : index
    %3 = vector.load %arg2[%c0_1, %c0_2] : memref<512x512xf32, #tpu.memory_space<vmem>>, vector<512x512xf32>
    tpu.vector_store %arg2[%c0_1, %c0_2], %2 {strides = array<i32>} : memref<512x512xf32, #tpu.memory_space<vmem>>, vector<512x512xf32>,
    return
  }
  func.func @transform_0(%arg0: i32) -> (i32, i32) {
    %c0_i32 = arith.constant 0 : i32
    %c0_i32_0 = arith.constant 0 : i32
    return %arg0, %c0_i32 : i32, i32
  }
  func.func @transform_1(%arg0: i32) -> (i32, i32) {
    %c0_i32 = arith.constant 0 : i32
    %c0_i32_0 = arith.constant 0 : i32
    return %arg0, %c0_i32 : i32, i32
  }
}

</mosaic_0001>

<bundles_post_ra>
// kernel: tpu_custom_call.1
= control target key start
LH: loop header
LB: loop body
LE: loop exit
PB: predicated region body
PF: predicated region fallthrough
CT: control target
= control target key end

     0   :  { %6 = vsyncpa [#allocation3], 0  ;;  %s1849_s0 = inlined_call_operand.hbm [shape: f32[1024,512], index: 0, kind: input, shape index: {}]   ;;  %s1850_s1 = inlined_call_operand.hbm [shape: f32[1024,512], index: 1, kind: output, shape index: {}]  }
   0x1   :  { %8 = vsyncpa [#allocation3 + $0x1], 0 }
   0x2   :  { %9 = vsyncpa [#allocation4], 0 }
   0x3   :  { %11 = vsyncpa [#allocation4 + $0x1], 0  ;;  %s1174_s6 = smov 0   ;;  %s1176_s7 = smov 0  }
   0x4   :  { %s1178_s8 = smov 0   ;;  %s1180_s9 = smov 0  }
   0x5 LB: > { %s1195_s10 = sadd.s32 4294967295, %s1156_s9   ;;  %s994_s11 = sadd.s32 4294967294, %s1156_s9   ;;  %s1156_s9 = sphi %s1180_s9, %s1865_s9   ;;  %s1152_s8 = sphi %s1178_s8, %s1864_s8   ;;  %s1148_s7 = sphi %s1176_s7, %s1863_s7   ;;  %s1144_s6 = sphi %s1174_s6, %s1862_s6  }
   0x6   : > { %s1199_s12 = sadd.s32 1, %s1156_s9   ;;  %s24_s13 = sadd.s32 1, %s1152_s8 }
   0x7   : > { %s21_s14 = ssub.s32 %s1156_s9, %s1199_s12  ;;  %p31_p0 = scmp.ne.s32.totalorder %s1152_s8, %s1148_s7 }
   0x8   : > { %p22_p1 = scmp.eq.s32.totalorder %s21_s14, 0  ;;  %p32_p2 = scmp.eq.s32.totalorder %s1156_s9, 0 }
   0x9   : > { %p37_p3 = scmp.ne.s32.totalorder %s1148_s7, %s1144_s6  ;;  %p38_p4 = scmp.eq.s32.totalorder %s1195_s10, 0 }
   0xa   : > { %s1211_s15 = scalar_select %p22_p1, %s1152_s8, %s24_s13  }
   0xb   : > { %p1213_p5 = por %p32_p2, %p31_p0  ;;  %p1217_p6 = por %p38_p4, %p37_p3 }
   0xc   : > { %p61_p7 = scmp.eq.s32.totalorder %s1195_s10, 1  ;;  %p67_p8 = scmp.eq.s32.totalorder %s994_s11, 1 }
   0xd   : > { %s1854_s17 = scalar_select %p1217_p6, 1, 0 }
   0xe   : > { %p1026_p10 = scmp.lt.s32.totalorder %s1156_s9, 2  ;;  %p1224_p11 = por %p61_p7, %p31_p0 }
   0xf   : > { %p1228_p12 = por %p67_p8, %p37_p3  ;;  %s87_s20 = sand.u32 1, %s1152_s8  }
  0x10   : > { %s1855_s18 = scalar_select %p1224_p11, 1, 0 }
  0x11   : > { %s1856_s19 = scalar_select %p1228_p12, 1, 0 }
  0x12   : > { %s1011_s21 = sshll.u32 %s1156_s9, 15  ;;  %s997_s22 = sshll.u32 %s87_s20, 11 }
  0x13   : > { %s1237_s25 = scalar_lea.hbm %s1849_s0, %s1011_s21  ;;  %s91_s26 = scalar_lea.vmem [#allocation2], %s997_s22 }
  0x14   : > { %s99_s27 = sshll.u32 %s91_s26, 4  ;;  %p1241_p13 = pnand %p1026_p10, %p1213_p5  ;;  %s1245_s27 = int_to_ptr.vmem [resolvable:$true] %s99_s27 }
  0x15   : > { %s1247_s29 = scalar_lea.sflag [#allocation3], %s87_s20  ;;  %s1064_s30 = scalar_lea.hbm %s1237_s25, 32768 }
  0x16   : > { %p1065_p0 = scmp.ne.s32.totalorder %s1237_s25, %s1064_s30  ;;  %p1066_p1 = pneg %p1241_p13 }
  0x17   : > { %s1069_s4 = scalar_lea.hbm %s1849_s0, 65536  ;;  %p1070_p4 = scmp.lt.s32.totalorder %s1237_s25, %s1849_s0 }
  0x18   : > { %p1067_p2 = pnand %p1066_p1, %p1065_p0  ;;  %p1071_p5 = scmp.lt.s32.totalorder %s1069_s4, %s1064_s30 }
  0x1a   : > { %p1068_p3 = pneg %p1067_p2  ;;  %p1072_p7 = por %p1071_p5, %p1070_p4 }
  0x1c   : > { %p1073_p8 = pnand %p1072_p7, %p1068_p3 }
  0x1e   : > { %1076 = shalt.err (!%p1073_p8)
}
  0x1f   : > { %s1077_s13 = scalar_lea.vmem %s1245_s27, 32768  ;;  %s1158_s14 = smov [#allocation2]  }
  0x20   : > { %p1078_p10 = scmp.ne.s32.totalorder %s1245_s27, %s1077_s13  ;;  %s1082_s16 = sshll.u32 %s1158_s14, 4  ;;  %s1083_s16 = int_to_ptr.vmem [resolvable:$false] %s1082_s16 }
  0x21   : > { %s1084_s20 = scalar_lea.vmem %s1083_s16, 65536  ;;  %p1085_p2 = scmp.lt.s32.totalorder %s1245_s27, %s1083_s16 }
  0x22   : > { %p1080_p9 = pnand %p1078_p10, %p1066_p1  ;;  %p1086_p12 = scmp.lt.s32.totalorder %s1084_s20, %s1077_s13 }
  0x24   : > { %p1081_p0 = pneg %p1080_p9  ;;  %p1087_p11 = por %p1086_p12, %p1085_p2 }
  0x26   : > { %p1088_p6 = pnand %p1087_p11, %p1081_p0 }
  0x28   : > { %1091 = shalt.err (!%p1088_p6)
}
  0x29   : > { %s1159_s21 = smov 512   ;;  %s1160_s22 = smov 32  }
  0x2a   : > { %1021 = dma.hbm_to_vmem [thread:$0]  (!%p1241_p13), %s1237_s25, 32768, %s1245_s27, %s1247_s29, %s1159_s21, %s1159_s21, %s1160_s22  }
  0x2b   : > { %p1001_p9 = scmp.ge.s32.totalorder %s1156_s9, 1  ;;  %p107_p1 = scmp.lt.s32.totalorder %s1156_s9, 3 }
  0x2d   : > { %p108_p3 = pnand %p1001_p9, %p107_p1 }
  0x2e   : > { %s1271_s23 = sand.u32 (!%p108_p3), 1, %s1148_s7   ;;  %p1858_p6 = scmp.ne.s32.totalorder (!%p108_p3), %s1854_s17, 0 }
  0x2f   : > { %111 = sbr.rel (%p108_p3) target bundleno = 204 (0xcc), region = 24  ;;  %s1002_s24 = sshll.u32 (!%p108_p3), %s1271_s23, 11 }
  0x30   : > { %s114_s26 = scalar_lea.sflag (!%p108_p3), [#allocation3], %s1271_s23  ;;  %s1275_s30 = scalar_lea.vmem (!%p108_p3), [#allocation2], %s1002_s24 }
  0x34   : > { %1135 = dma.done.wait (%p1858_p6), %s114_s26, 32768  }
  0x35   : > { %1137 = vsyncadd (%p1858_p6), %s114_s26, 4294934528  ;;  %v138_v0 = vld [vmem:[%s1275_s30] sm:$0xff]  ;;  %v139_v1 = vld [vmem:[%s1275_s30 + $0x8] sm:$0xff]  ;;  %s1013_s25 = sshll.u32 %s1195_s10, 15  ;;  %s1285_s27 = scalar_lea.vmem [#allocation5], %s1002_s24 }
  0x36   : > { %v140_v2 = vld [vmem:[%s1275_s30 + $0x10] sm:$0xff]  ;;  %s921_s17 = sshll.u32 %s1285_s27, 4  ;;  %v394_v3 = vmax.f32 %v138_v0, 0.0  ;;  %v395_v4 = vmax.f32 %v139_v1, 0.0  ;;  %v141_v6 = vld [vmem:[%s1275_s30 + $0x18] sm:$0xff]  ;;  %v142_v7 = vld [vmem:[%s1275_s30 + $0x20] sm:$0xff]  ;;  %s1795_s2 = scalar_lea.hbm %s1850_s1, %s1013_s25  ;;  %s1799_s17 = int_to_ptr.vmem [resolvable:$true] %s921_s17 }
  0x37   : > { %v396_v5 = vmax.f32 %v140_v2, 0.0  ;;  %v143_v8 = vld [vmem:[%s1275_s30 + $0x28] sm:$0xff]  ;;  %v397_v9 = vmax.f32 %v141_v6, 0.0  ;;  %v398_v10 = vmax.f32 %v142_v7, 0.0  ;;  %v144_v12 = vld [vmem:[%s1275_s30 + $0x30] sm:$0xff]  ;;  %v145_v13 = vld [vmem:[%s1275_s30 + $0x38] sm:$0xff] }
  0x38   : > { %v399_v11 = vmax.f32 %v143_v8, 0.0  ;;  %v146_v14 = vld [vmem:[%s1275_s30 + $0x40] sm:$0xff]  ;;  %650 = vst [vmem:[%s1285_s27] sm:$0xff] %v394_v3  ;;  %651 = vst [vmem:[%s1285_s27 + $0x8] sm:$0xff] %v395_v4  ;;  %v400_v15 = vmax.f32 %v144_v12, 0.0  ;;  %v401_v16 = vmax.f32 %v145_v13, 0.0  ;;  %v147_v18 = vld [vmem:[%s1275_s30 + $0x48] sm:$0xff] }
  0x39   : > { %652 = vst [vmem:[%s1285_s27 + $0x10] sm:$0xff] %v396_v5  ;;  %v402_v17 = vmax.f32 %v146_v14, 0.0  ;;  %v148_v19 = vld [vmem:[%s1275_s30 + $0x50] sm:$0xff]  ;;  %v149_v20 = vld [vmem:[%s1275_s30 + $0x58] sm:$0xff]  ;;  %653 = vst [vmem:[%s1285_s27 + $0x18] sm:$0xff] %v397_v9  ;;  %v403_v21 = vmax.f32 %v147_v18, 0.0 }
  0x3a   : > { %654 = vst [vmem:[%s1285_s27 + $0x20] sm:$0xff] %v398_v10  ;;  %655 = vst [vmem:[%s1285_s27 + $0x28] sm:$0xff] %v399_v11  ;;  %v404_v22 = vmax.f32 %v148_v19, 0.0  ;;  %v405_v23 = vmax.f32 %v149_v20, 0.0  ;;  %v150_v24 = vld [vmem:[%s1275_s30 + $0x60] sm:$0xff]  ;;  %v151_v25 = vld [vmem:[%s1275_s30 + $0x68] sm:$0xff] }
  0x3b   : > { %v152_v26 = vld [vmem:[%s1275_s30 + $0x70] sm:$0xff]  ;;  %656 = vst [vmem:[%s1285_s27 + $0x30] sm:$0xff] %v400_v15  ;;  %657 = vst [vmem:[%s1285_s27 + $0x38] sm:$0xff] %v401_v16  ;;  %v406_v27 = vmax.f32 %v150_v24, 0.0  ;;  %v407_v28 = vmax.f32 %v151_v25, 0.0  ;;  %v153_v30 = vld [vmem:[%s1275_s30 + $0x78] sm:$0xff] }
  0x3c   : > { %658 = vst [vmem:[%s1285_s27 + $0x40] sm:$0xff] %v402_v17  ;;  %v408_v29 = vmax.f32 %v152_v26, 0.0  ;;  %v154_v31 = vld [vmem:[%s1275_s30 + $0x80] sm:$0xff]  ;;  %v155_v32 = vld [vmem:[%s1275_s30 + $0x88] sm:$0xff]  ;;  %659 = vst [vmem:[%s1285_s27 + $0x48] sm:$0xff] %v403_v21  ;;  %v409_v33 = vmax.f32 %v153_v30, 0.0 }
  0x3d   : > { %660 = vst [vmem:[%s1285_s27 + $0x50] sm:$0xff] %v404_v22  ;;  %661 = vst [vmem:[%s1285_s27 + $0x58] sm:$0xff] %v405_v23  ;;  %v410_v34 = vmax.f32 %v154_v31, 0.0  ;;  %v411_v35 = vmax.f32 %v155_v32, 0.0  ;;  %v156_v36 = vld [vmem:[%s1275_s30 + $0x90] sm:$0xff]  ;;  %v157_v37 = vld [vmem:[%s1275_s30 + $0x98] sm:$0xff] }
  0x3e   : > { %v158_v38 = vld [vmem:[%s1275_s30 + $0xa0] sm:$0xff]  ;;  %662 = vst [vmem:[%s1285_s27 + $0x60] sm:$0xff] %v406_v27  ;;  %663 = vst [vmem:[%s1285_s27 + $0x68] sm:$0xff] %v407_v28  ;;  %v412_v39 = vmax.f32 %v156_v36, 0.0  ;;  %v413_v40 = vmax.f32 %v157_v37, 0.0  ;;  %v159_v42 = vld [vmem:[%s1275_s30 + $0xa8] sm:$0xff] }
  0x3f   : > { %664 = vst [vmem:[%s1285_s27 + $0x70] sm:$0xff] %v408_v29  ;;  %v414_v41 = vmax.f32 %v158_v38, 0.0  ;;  %v160_v43 = vld [vmem:[%s1275_s30 + $0xb0] sm:$0xff]  ;;  %v161_v44 = vld [vmem:[%s1275_s30 + $0xb8] sm:$0xff]  ;;  %665 = vst [vmem:[%s1285_s27 + $0x78] sm:$0xff] %v409_v33  ;;  %v415_v45 = vmax.f32 %v159_v42, 0.0 }
  0x40   : > { %666 = vst [vmem:[%s1285_s27 + $0x80] sm:$0xff] %v410_v34  ;;  %667 = vst [vmem:[%s1285_s27 + $0x88] sm:$0xff] %v411_v35  ;;  %v416_v46 = vmax.f32 %v160_v43, 0.0  ;;  %v417_v47 = vmax.f32 %v161_v44, 0.0  ;;  %v162_v48 = vld [vmem:[%s1275_s30 + $0xc0] sm:$0xff]  ;;  %v163_v49 = vld [vmem:[%s1275_s30 + $0xc8] sm:$0xff] }
  0x41   : > { %v164_v50 = vld [vmem:[%s1275_s30 + $0xd0] sm:$0xff]  ;;  %668 = vst [vmem:[%s1285_s27 + $0x90] sm:$0xff] %v412_v39  ;;  %669 = vst [vmem:[%s1285_s27 + $0x98] sm:$0xff] %v413_v40  ;;  %v418_v51 = vmax.f32 %v162_v48, 0.0  ;;  %v419_v52 = vmax.f32 %v163_v49, 0.0  ;;  %v165_v54 = vld [vmem:[%s1275_s30 + $0xd8] sm:$0xff] }
  0x42   : > { %670 = vst [vmem:[%s1285_s27 + $0xa0] sm:$0xff] %v414_v41  ;;  %v420_v53 = vmax.f32 %v164_v50, 0.0  ;;  %v166_v55 = vld [vmem:[%s1275_s30 + $0xe0] sm:$0xff]  ;;  %v167_v56 = vld [vmem:[%s1275_s30 + $0xe8] sm:$0xff]  ;;  %671 = vst [vmem:[%s1285_s27 + $0xa8] sm:$0xff] %v415_v45  ;;  %v421_v57 = vmax.f32 %v165_v54, 0.0 }
  0x43   : > { %672 = vst [vmem:[%s1285_s27 + $0xb0] sm:$0xff] %v416_v46  ;;  %673 = vst [vmem:[%s1285_s27 + $0xb8] sm:$0xff] %v417_v47  ;;  %v422_v58 = vmax.f32 %v166_v55, 0.0  ;;  %v423_v59 = vmax.f32 %v167_v56, 0.0  ;;  %v168_v60 = vld [vmem:[%s1275_s30 + $0xf0] sm:$0xff]  ;;  %v169_v61 = vld [vmem:[%s1275_s30 + $0xf8] sm:$0xff] }
  0x44   : > { %v170_v62 = vld [vmem:[%s1275_s30 + $0x100] sm:$0xff]  ;;  %674 = vst [vmem:[%s1285_s27 + $0xc0] sm:$0xff] %v418_v51  ;;  %675 = vst [vmem:[%s1285_s27 + $0xc8] sm:$0xff] %v419_v52  ;;  %v424_v63 = vmax.f32 %v168_v60, 0.0  ;;  %v425_v0 = vmax.f32 %v169_v61, 0.0  ;;  %v171_v2 = vld [vmem:[%s1275_s30 + $0x108] sm:$0xff] }
  0x45   : > { %676 = vst [vmem:[%s1285_s27 + $0xd0] sm:$0xff] %v420_v53  ;;  %v426_v1 = vmax.f32 %v170_v62, 0.0  ;;  %v172_v3 = vld [vmem:[%s1275_s30 + $0x110] sm:$0xff]  ;;  %v173_v4 = vld [vmem:[%s1275_s30 + $0x118] sm:$0xff]  ;;  %677 = vst [vmem:[%s1285_s27 + $0xd8] sm:$0xff] %v421_v57  ;;  %v427_v5 = vmax.f32 %v171_v2, 0.0 }
  0x46   : > { %678 = vst [vmem:[%s1285_s27 + $0xe0] sm:$0xff] %v422_v58  ;;  %679 = vst [vmem:[%s1285_s27 + $0xe8] sm:$0xff] %v423_v59  ;;  %v428_v6 = vmax.f32 %v172_v3, 0.0  ;;  %v429_v7 = vmax.f32 %v173_v4, 0.0  ;;  %v174_v8 = vld [vmem:[%s1275_s30 + $0x120] sm:$0xff]  ;;  %v175_v9 = vld [vmem:[%s1275_s30 + $0x128] sm:$0xff] }
  0x47   : > { %v176_v10 = vld [vmem:[%s1275_s30 + $0x130] sm:$0xff]  ;;  %680 = vst [vmem:[%s1285_s27 + $0xf0] sm:$0xff] %v424_v63  ;;  %681 = vst [vmem:[%s1285_s27 + $0xf8] sm:$0xff] %v425_v0  ;;  %v430_v11 = vmax.f32 %v174_v8, 0.0  ;;  %v431_v12 = vmax.f32 %v175_v9, 0.0  ;;  %v177_v14 = vld [vmem:[%s1275_s30 + $0x138] sm:$0xff] }
  0x48   : > { %682 = vst [vmem:[%s1285_s27 + $0x100] sm:$0xff] %v426_v1  ;;  %v432_v13 = vmax.f32 %v176_v10, 0.0  ;;  %v178_v15 = vld [vmem:[%s1275_s30 + $0x140] sm:$0xff]  ;;  %v179_v16 = vld [vmem:[%s1275_s30 + $0x148] sm:$0xff]  ;;  %683 = vst [vmem:[%s1285_s27 + $0x108] sm:$0xff] %v427_v5  ;;  %v433_v17 = vmax.f32 %v177_v14, 0.0 }
  0x49   : > { %684 = vst [vmem:[%s1285_s27 + $0x110] sm:$0xff] %v428_v6  ;;  %685 = vst [vmem:[%s1285_s27 + $0x118] sm:$0xff] %v429_v7  ;;  %v434_v18 = vmax.f32 %v178_v15, 0.0  ;;  %v435_v19 = vmax.f32 %v179_v16, 0.0  ;;  %v180_v20 = vld [vmem:[%s1275_s30 + $0x150] sm:$0xff]  ;;  %v181_v21 = vld [vmem:[%s1275_s30 + $0x158] sm:$0xff] }
  0x4a   : > { %v182_v22 = vld [vmem:[%s1275_s30 + $0x160] sm:$0xff]  ;;  %686 = vst [vmem:[%s1285_s27 + $0x120] sm:$0xff] %v430_v11  ;;  %687 = vst [vmem:[%s1285_s27 + $0x128] sm:$0xff] %v431_v12  ;;  %v436_v23 = vmax.f32 %v180_v20, 0.0  ;;  %v437_v24 = vmax.f32 %v181_v21, 0.0  ;;  %v183_v26 = vld [vmem:[%s1275_s30 + $0x168] sm:$0xff] }
  0x4b   : > { %688 = vst [vmem:[%s1285_s27 + $0x130] sm:$0xff] %v432_v13  ;;  %v438_v25 = vmax.f32 %v182_v22, 0.0  ;;  %v184_v27 = vld [vmem:[%s1275_s30 + $0x170] sm:$0xff]  ;;  %v185_v28 = vld [vmem:[%s1275_s30 + $0x178] sm:$0xff]  ;;  %689 = vst [vmem:[%s1285_s27 + $0x138] sm:$0xff] %v433_v17  ;;  %v439_v29 = vmax.f32 %v183_v26, 0.0 }
  0x4c   : > { %690 = vst [vmem:[%s1285_s27 + $0x140] sm:$0xff] %v434_v18  ;;  %691 = vst [vmem:[%s1285_s27 + $0x148] sm:$0xff] %v435_v19  ;;  %v440_v30 = vmax.f32 %v184_v27, 0.0  ;;  %v441_v31 = vmax.f32 %v185_v28, 0.0  ;;  %v186_v32 = vld [vmem:[%s1275_s30 + $0x180] sm:$0xff]  ;;  %v187_v33 = vld [vmem:[%s1275_s30 + $0x188] sm:$0xff] }
  0x4d   : > { %v188_v34 = vld [vmem:[%s1275_s30 + $0x190] sm:$0xff]  ;;  %692 = vst [vmem:[%s1285_s27 + $0x150] sm:$0xff] %v436_v23  ;;  %693 = vst [vmem:[%s1285_s27 + $0x158] sm:$0xff] %v437_v24  ;;  %v442_v35 = vmax.f32 %v186_v32, 0.0  ;;  %v443_v36 = vmax.f32 %v187_v33, 0.0  ;;  %v189_v38 = vld [vmem:[%s1275_s30 + $0x198] sm:$0xff] }
  0x4e   : > { %694 = vst [vmem:[%s1285_s27 + $0x160] sm:$0xff] %v438_v25  ;;  %v444_v37 = vmax.f32 %v188_v34, 0.0  ;;  %v190_v39 = vld [vmem:[%s1275_s30 + $0x1a0] sm:$0xff]  ;;  %v191_v40 = vld [vmem:[%s1275_s30 + $0x1a8] sm:$0xff]  ;;  %695 = vst [vmem:[%s1285_s27 + $0x168] sm:$0xff] %v439_v29  ;;  %v445_v41 = vmax.f32 %v189_v38, 0.0 }
  0x4f   : > { %696 = vst [vmem:[%s1285_s27 + $0x170] sm:$0xff] %v440_v30  ;;  %697 = vst [vmem:[%s1285_s27 + $0x178] sm:$0xff] %v441_v31  ;;  %v446_v42 = vmax.f32 %v190_v39, 0.0  ;;  %v447_v43 = vmax.f32 %v191_v40, 0.0  ;;  %v192_v44 = vld [vmem:[%s1275_s30 + $0x1b0] sm:$0xff]  ;;  %v193_v45 = vld [vmem:[%s1275_s30 + $0x1b8] sm:$0xff] }
  0x50   : > { %v194_v46 = vld [vmem:[%s1275_s30 + $0x1c0] sm:$0xff]  ;;  %698 = vst [vmem:[%s1285_s27 + $0x180] sm:$0xff] %v442_v35  ;;  %699 = vst [vmem:[%s1285_s27 + $0x188] sm:$0xff] %v443_v36  ;;  %v448_v47 = vmax.f32 %v192_v44, 0.0  ;;  %v449_v48 = vmax.f32 %v193_v45, 0.0  ;;  %v195_v50 = vld [vmem:[%s1275_s30 + $0x1c8] sm:$0xff] }
  0x51   : > { %700 = vst [vmem:[%s1285_s27 + $0x190] sm:$0xff] %v444_v37  ;;  %v450_v49 = vmax.f32 %v194_v46, 0.0  ;;  %v196_v51 = vld [vmem:[%s1275_s30 + $0x1d0] sm:$0xff]  ;;  %v197_v52 = vld [vmem:[%s1275_s30 + $0x1d8] sm:$0xff]  ;;  %701 = vst [vmem:[%s1285_s27 + $0x198] sm:$0xff] %v445_v41  ;;  %v451_v53 = vmax.f32 %v195_v50, 0.0 }
  0x52   : > { %702 = vst [vmem:[%s1285_s27 + $0x1a0] sm:$0xff] %v446_v42  ;;  %703 = vst [vmem:[%s1285_s27 + $0x1a8] sm:$0xff] %v447_v43  ;;  %v452_v54 = vmax.f32 %v196_v51, 0.0  ;;  %v453_v55 = vmax.f32 %v197_v52, 0.0  ;;  %v198_v56 = vld [vmem:[%s1275_s30 + $0x1e0] sm:$0xff]  ;;  %v199_v57 = vld [vmem:[%s1275_s30 + $0x1e8] sm:$0xff] }
  0x53   : > { %v200_v58 = vld [vmem:[%s1275_s30 + $0x1f0] sm:$0xff]  ;;  %704 = vst [vmem:[%s1285_s27 + $0x1b0] sm:$0xff] %v448_v47  ;;  %705 = vst [vmem:[%s1285_s27 + $0x1b8] sm:$0xff] %v449_v48  ;;  %v454_v59 = vmax.f32 %v198_v56, 0.0  ;;  %v455_v60 = vmax.f32 %v199_v57, 0.0  ;;  %v201_v62 = vld [vmem:[%s1275_s30 + $0x1f8] sm:$0xff] }
  0x54   : > { %706 = vst [vmem:[%s1285_s27 + $0x1c0] sm:$0xff] %v450_v49  ;;  %v456_v61 = vmax.f32 %v200_v58, 0.0  ;;  %v202_v63 = vld [vmem:[%s1275_s30 + $0x200] sm:$0xff]  ;;  %v203_v0 = vld [vmem:[%s1275_s30 + $0x208] sm:$0xff]  ;;  %707 = vst [vmem:[%s1285_s27 + $0x1c8] sm:$0xff] %v451_v53  ;;  %v457_v1 = vmax.f32 %v201_v62, 0.0 }
  0x55   : > { %708 = vst [vmem:[%s1285_s27 + $0x1d0] sm:$0xff] %v452_v54  ;;  %709 = vst [vmem:[%s1285_s27 + $0x1d8] sm:$0xff] %v453_v55  ;;  %v458_v2 = vmax.f32 %v202_v63, 0.0  ;;  %v459_v3 = vmax.f32 %v203_v0, 0.0  ;;  %v204_v4 = vld [vmem:[%s1275_s30 + $0x210] sm:$0xff]  ;;  %v205_v5 = vld [vmem:[%s1275_s30 + $0x218] sm:$0xff] }
  0x56   : > { %v206_v6 = vld [vmem:[%s1275_s30 + $0x220] sm:$0xff]  ;;  %710 = vst [vmem:[%s1285_s27 + $0x1e0] sm:$0xff] %v454_v59  ;;  %711 = vst [vmem:[%s1285_s27 + $0x1e8] sm:$0xff] %v455_v60  ;;  %v460_v7 = vmax.f32 %v204_v4, 0.0  ;;  %v461_v8 = vmax.f32 %v205_v5, 0.0  ;;  %v207_v10 = vld [vmem:[%s1275_s30 + $0x228] sm:$0xff] }
  0x57   : > { %712 = vst [vmem:[%s1285_s27 + $0x1f0] sm:$0xff] %v456_v61  ;;  %v462_v9 = vmax.f32 %v206_v6, 0.0  ;;  %v208_v11 = vld [vmem:[%s1275_s30 + $0x230] sm:$0xff]  ;;  %v209_v12 = vld [vmem:[%s1275_s30 + $0x238] sm:$0xff]  ;;  %713 = vst [vmem:[%s1285_s27 + $0x1f8] sm:$0xff] %v457_v1  ;;  %v463_v13 = vmax.f32 %v207_v10, 0.0 }
  0x58   : > { %714 = vst [vmem:[%s1285_s27 + $0x200] sm:$0xff] %v458_v2  ;;  %715 = vst [vmem:[%s1285_s27 + $0x208] sm:$0xff] %v459_v3  ;;  %v464_v14 = vmax.f32 %v208_v11, 0.0  ;;  %v465_v15 = vmax.f32 %v209_v12, 0.0  ;;  %v210_v16 = vld [vmem:[%s1275_s30 + $0x240] sm:$0xff]  ;;  %v211_v17 = vld [vmem:[%s1275_s30 + $0x248] sm:$0xff] }
  0x59   : > { %v212_v18 = vld [vmem:[%s1275_s30 + $0x250] sm:$0xff]  ;;  %716 = vst [vmem:[%s1285_s27 + $0x210] sm:$0xff] %v460_v7  ;;  %717 = vst [vmem:[%s1285_s27 + $0x218] sm:$0xff] %v461_v8  ;;  %v466_v19 = vmax.f32 %v210_v16, 0.0  ;;  %v467_v20 = vmax.f32 %v211_v17, 0.0  ;;  %v213_v22 = vld [vmem:[%s1275_s30 + $0x258] sm:$0xff] }
  0x5a   : > { %718 = vst [vmem:[%s1285_s27 + $0x220] sm:$0xff] %v462_v9  ;;  %v468_v21 = vmax.f32 %v212_v18, 0.0  ;;  %v214_v23 = vld [vmem:[%s1275_s30 + $0x260] sm:$0xff]  ;;  %v215_v24 = vld [vmem:[%s1275_s30 + $0x268] sm:$0xff]  ;;  %719 = vst [vmem:[%s1285_s27 + $0x228] sm:$0xff] %v463_v13  ;;  %v469_v25 = vmax.f32 %v213_v22, 0.0 }
  0x5b   : > { %720 = vst [vmem:[%s1285_s27 + $0x230] sm:$0xff] %v464_v14  ;;  %721 = vst [vmem:[%s1285_s27 + $0x238] sm:$0xff] %v465_v15  ;;  %v470_v26 = vmax.f32 %v214_v23, 0.0  ;;  %v471_v27 = vmax.f32 %v215_v24, 0.0  ;;  %v216_v28 = vld [vmem:[%s1275_s30 + $0x270] sm:$0xff]  ;;  %v217_v29 = vld [vmem:[%s1275_s30 + $0x278] sm:$0xff] }
  0x5c   : > { %v218_v30 = vld [vmem:[%s1275_s30 + $0x280] sm:$0xff]  ;;  %722 = vst [vmem:[%s1285_s27 + $0x240] sm:$0xff] %v466_v19  ;;  %723 = vst [vmem:[%s1285_s27 + $0x248] sm:$0xff] %v467_v20  ;;  %v472_v31 = vmax.f32 %v216_v28, 0.0  ;;  %v473_v32 = vmax.f32 %v217_v29, 0.0  ;;  %v219_v34 = vld [vmem:[%s1275_s30 + $0x288] sm:$0xff] }
  0x5d   : > { %724 = vst [vmem:[%s1285_s27 + $0x250] sm:$0xff] %v468_v21  ;;  %v474_v33 = vmax.f32 %v218_v30, 0.0  ;;  %v220_v35 = vld [vmem:[%s1275_s30 + $0x290] sm:$0xff]  ;;  %v221_v36 = vld [vmem:[%s1275_s30 + $0x298] sm:$0xff]  ;;  %725 = vst [vmem:[%s1285_s27 + $0x258] sm:$0xff] %v469_v25  ;;  %v475_v37 = vmax.f32 %v219_v34, 0.0 }
  0x5e   : > { %726 = vst [vmem:[%s1285_s27 + $0x260] sm:$0xff] %v470_v26  ;;  %727 = vst [vmem:[%s1285_s27 + $0x268] sm:$0xff] %v471_v27  ;;  %v476_v38 = vmax.f32 %v220_v35, 0.0  ;;  %v477_v39 = vmax.f32 %v221_v36, 0.0  ;;  %v222_v40 = vld [vmem:[%s1275_s30 + $0x2a0] sm:$0xff]  ;;  %v223_v41 = vld [vmem:[%s1275_s30 + $0x2a8] sm:$0xff] }
  0x5f   : > { %v224_v42 = vld [vmem:[%s1275_s30 + $0x2b0] sm:$0xff]  ;;  %728 = vst [vmem:[%s1285_s27 + $0x270] sm:$0xff] %v472_v31  ;;  %729 = vst [vmem:[%s1285_s27 + $0x278] sm:$0xff] %v473_v32  ;;  %v478_v43 = vmax.f32 %v222_v40, 0.0  ;;  %v479_v44 = vmax.f32 %v223_v41, 0.0  ;;  %v225_v46 = vld [vmem:[%s1275_s30 + $0x2b8] sm:$0xff] }
  0x60   : > { %730 = vst [vmem:[%s1285_s27 + $0x280] sm:$0xff] %v474_v33  ;;  %v480_v45 = vmax.f32 %v224_v42, 0.0  ;;  %v226_v47 = vld [vmem:[%s1275_s30 + $0x2c0] sm:$0xff]  ;;  %v227_v48 = vld [vmem:[%s1275_s30 + $0x2c8] sm:$0xff]  ;;  %731 = vst [vmem:[%s1285_s27 + $0x288] sm:$0xff] %v475_v37  ;;  %v481_v49 = vmax.f32 %v225_v46, 0.0 }
  0x61   : > { %732 = vst [vmem:[%s1285_s27 + $0x290] sm:$0xff] %v476_v38  ;;  %733 = vst [vmem:[%s1285_s27 + $0x298] sm:$0xff] %v477_v39  ;;  %v482_v50 = vmax.f32 %v226_v47, 0.0  ;;  %v483_v51 = vmax.f32 %v227_v48, 0.0  ;;  %v228_v52 = vld [vmem:[%s1275_s30 + $0x2d0] sm:$0xff]  ;;  %v229_v53 = vld [vmem:[%s1275_s30 + $0x2d8] sm:$0xff] }
  0x62   : > { %v230_v54 = vld [vmem:[%s1275_s30 + $0x2e0] sm:$0xff]  ;;  %734 = vst [vmem:[%s1285_s27 + $0x2a0] sm:$0xff] %v478_v43  ;;  %735 = vst [vmem:[%s1285_s27 + $0x2a8] sm:$0xff] %v479_v44  ;;  %v484_v55 = vmax.f32 %v228_v52, 0.0  ;;  %v485_v56 = vmax.f32 %v229_v53, 0.0  ;;  %v231_v58 = vld [vmem:[%s1275_s30 + $0x2e8] sm:$0xff] }
  0x63   : > { %736 = vst [vmem:[%s1285_s27 + $0x2b0] sm:$0xff] %v480_v45  ;;  %v486_v57 = vmax.f32 %v230_v54, 0.0  ;;  %v232_v59 = vld [vmem:[%s1275_s30 + $0x2f0] sm:$0xff]  ;;  %v233_v60 = vld [vmem:[%s1275_s30 + $0x2f8] sm:$0xff]  ;;  %737 = vst [vmem:[%s1285_s27 + $0x2b8] sm:$0xff] %v481_v49  ;;  %v487_v61 = vmax.f32 %v231_v58, 0.0 }
  0x64   : > { %738 = vst [vmem:[%s1285_s27 + $0x2c0] sm:$0xff] %v482_v50  ;;  %739 = vst [vmem:[%s1285_s27 + $0x2c8] sm:$0xff] %v483_v51  ;;  %v488_v62 = vmax.f32 %v232_v59, 0.0  ;;  %v489_v63 = vmax.f32 %v233_v60, 0.0  ;;  %v234_v0 = vld [vmem:[%s1275_s30 + $0x300] sm:$0xff]  ;;  %v235_v1 = vld [vmem:[%s1275_s30 + $0x308] sm:$0xff] }
  0x65   : > { %v236_v2 = vld [vmem:[%s1275_s30 + $0x310] sm:$0xff]  ;;  %740 = vst [vmem:[%s1285_s27 + $0x2d0] sm:$0xff] %v484_v55  ;;  %741 = vst [vmem:[%s1285_s27 + $0x2d8] sm:$0xff] %v485_v56  ;;  %v490_v3 = vmax.f32 %v234_v0, 0.0  ;;  %v491_v4 = vmax.f32 %v235_v1, 0.0  ;;  %v237_v6 = vld [vmem:[%s1275_s30 + $0x318] sm:$0xff] }
  0x66   : > { %742 = vst [vmem:[%s1285_s27 + $0x2e0] sm:$0xff] %v486_v57  ;;  %v492_v5 = vmax.f32 %v236_v2, 0.0  ;;  %v238_v7 = vld [vmem:[%s1275_s30 + $0x320] sm:$0xff]  ;;  %v239_v8 = vld [vmem:[%s1275_s30 + $0x328] sm:$0xff]  ;;  %743 = vst [vmem:[%s1285_s27 + $0x2e8] sm:$0xff] %v487_v61  ;;  %v493_v9 = vmax.f32 %v237_v6, 0.0 }
  0x67   : > { %744 = vst [vmem:[%s1285_s27 + $0x2f0] sm:$0xff] %v488_v62  ;;  %745 = vst [vmem:[%s1285_s27 + $0x2f8] sm:$0xff] %v489_v63  ;;  %v494_v10 = vmax.f32 %v238_v7, 0.0  ;;  %v495_v11 = vmax.f32 %v239_v8, 0.0  ;;  %v240_v12 = vld [vmem:[%s1275_s30 + $0x330] sm:$0xff]  ;;  %v241_v13 = vld [vmem:[%s1275_s30 + $0x338] sm:$0xff] }
  0x68   : > { %v242_v14 = vld [vmem:[%s1275_s30 + $0x340] sm:$0xff]  ;;  %746 = vst [vmem:[%s1285_s27 + $0x300] sm:$0xff] %v490_v3  ;;  %747 = vst [vmem:[%s1285_s27 + $0x308] sm:$0xff] %v491_v4  ;;  %v496_v15 = vmax.f32 %v240_v12, 0.0  ;;  %v497_v16 = vmax.f32 %v241_v13, 0.0  ;;  %v243_v18 = vld [vmem:[%s1275_s30 + $0x348] sm:$0xff] }
  0x69   : > { %748 = vst [vmem:[%s1285_s27 + $0x310] sm:$0xff] %v492_v5  ;;  %v498_v17 = vmax.f32 %v242_v14, 0.0  ;;  %v244_v19 = vld [vmem:[%s1275_s30 + $0x350] sm:$0xff]  ;;  %v245_v20 = vld [vmem:[%s1275_s30 + $0x358] sm:$0xff]  ;;  %749 = vst [vmem:[%s1285_s27 + $0x318] sm:$0xff] %v493_v9  ;;  %v499_v21 = vmax.f32 %v243_v18, 0.0 }
  0x6a   : > { %750 = vst [vmem:[%s1285_s27 + $0x320] sm:$0xff] %v494_v10  ;;  %751 = vst [vmem:[%s1285_s27 + $0x328] sm:$0xff] %v495_v11  ;;  %v500_v22 = vmax.f32 %v244_v19, 0.0  ;;  %v501_v23 = vmax.f32 %v245_v20, 0.0  ;;  %v246_v24 = vld [vmem:[%s1275_s30 + $0x360] sm:$0xff]  ;;  %v247_v25 = vld [vmem:[%s1275_s30 + $0x368] sm:$0xff] }
  0x6b   : > { %v248_v26 = vld [vmem:[%s1275_s30 + $0x370] sm:$0xff]  ;;  %752 = vst [vmem:[%s1285_s27 + $0x330] sm:$0xff] %v496_v15  ;;  %753 = vst [vmem:[%s1285_s27 + $0x338] sm:$0xff] %v497_v16  ;;  %v502_v27 = vmax.f32 %v246_v24, 0.0  ;;  %v503_v28 = vmax.f32 %v247_v25, 0.0  ;;  %v249_v30 = vld [vmem:[%s1275_s30 + $0x378] sm:$0xff] }
  0x6c   : > { %754 = vst [vmem:[%s1285_s27 + $0x340] sm:$0xff] %v498_v17  ;;  %v504_v29 = vmax.f32 %v248_v26, 0.0  ;;  %v250_v31 = vld [vmem:[%s1275_s30 + $0x380] sm:$0xff]  ;;  %v251_v32 = vld [vmem:[%s1275_s30 + $0x388] sm:$0xff]  ;;  %755 = vst [vmem:[%s1285_s27 + $0x348] sm:$0xff] %v499_v21  ;;  %v505_v33 = vmax.f32 %v249_v30, 0.0 }
  0x6d   : > { %756 = vst [vmem:[%s1285_s27 + $0x350] sm:$0xff] %v500_v22  ;;  %757 = vst [vmem:[%s1285_s27 + $0x358] sm:$0xff] %v501_v23  ;;  %v506_v34 = vmax.f32 %v250_v31, 0.0  ;;  %v507_v35 = vmax.f32 %v251_v32, 0.0  ;;  %v252_v36 = vld [vmem:[%s1275_s30 + $0x390] sm:$0xff]  ;;  %v253_v37 = vld [vmem:[%s1275_s30 + $0x398] sm:$0xff] }
  0x6e   : > { %v254_v38 = vld [vmem:[%s1275_s30 + $0x3a0] sm:$0xff]  ;;  %758 = vst [vmem:[%s1285_s27 + $0x360] sm:$0xff] %v502_v27  ;;  %759 = vst [vmem:[%s1285_s27 + $0x368] sm:$0xff] %v503_v28  ;;  %v508_v39 = vmax.f32 %v252_v36, 0.0  ;;  %v509_v40 = vmax.f32 %v253_v37, 0.0  ;;  %v255_v42 = vld [vmem:[%s1275_s30 + $0x3a8] sm:$0xff] }
  0x6f   : > { %760 = vst [vmem:[%s1285_s27 + $0x370] sm:$0xff] %v504_v29  ;;  %v510_v41 = vmax.f32 %v254_v38, 0.0  ;;  %v256_v43 = vld [vmem:[%s1275_s30 + $0x3b0] sm:$0xff]  ;;  %v257_v44 = vld [vmem:[%s1275_s30 + $0x3b8] sm:$0xff]  ;;  %761 = vst [vmem:[%s1285_s27 + $0x378] sm:$0xff] %v505_v33  ;;  %v511_v45 = vmax.f32 %v255_v42, 0.0 }
  0x70   : > { %762 = vst [vmem:[%s1285_s27 + $0x380] sm:$0xff] %v506_v34  ;;  %763 = vst [vmem:[%s1285_s27 + $0x388] sm:$0xff] %v507_v35  ;;  %v512_v46 = vmax.f32 %v256_v43, 0.0  ;;  %v513_v47 = vmax.f32 %v257_v44, 0.0  ;;  %v258_v48 = vld [vmem:[%s1275_s30 + $0x3c0] sm:$0xff]  ;;  %v259_v49 = vld [vmem:[%s1275_s30 + $0x3c8] sm:$0xff] }
  0x71   : > { %v260_v50 = vld [vmem:[%s1275_s30 + $0x3d0] sm:$0xff]  ;;  %764 = vst [vmem:[%s1285_s27 + $0x390] sm:$0xff] %v508_v39  ;;  %765 = vst [vmem:[%s1285_s27 + $0x398] sm:$0xff] %v509_v40  ;;  %v514_v51 = vmax.f32 %v258_v48, 0.0  ;;  %v515_v52 = vmax.f32 %v259_v49, 0.0  ;;  %v261_v54 = vld [vmem:[%s1275_s30 + $0x3d8] sm:$0xff] }
  0x72   : > { %766 = vst [vmem:[%s1285_s27 + $0x3a0] sm:$0xff] %v510_v41  ;;  %v516_v53 = vmax.f32 %v260_v50, 0.0  ;;  %v262_v55 = vld [vmem:[%s1275_s30 + $0x3e0] sm:$0xff]  ;;  %v263_v56 = vld [vmem:[%s1275_s30 + $0x3e8] sm:$0xff]  ;;  %767 = vst [vmem:[%s1285_s27 + $0x3a8] sm:$0xff] %v511_v45  ;;  %v517_v57 = vmax.f32 %v261_v54, 0.0 }
  0x73   : > { %768 = vst [vmem:[%s1285_s27 + $0x3b0] sm:$0xff] %v512_v46  ;;  %769 = vst [vmem:[%s1285_s27 + $0x3b8] sm:$0xff] %v513_v47  ;;  %v518_v58 = vmax.f32 %v262_v55, 0.0  ;;  %v519_v59 = vmax.f32 %v263_v56, 0.0  ;;  %v264_v60 = vld [vmem:[%s1275_s30 + $0x3f0] sm:$0xff]  ;;  %v265_v61 = vld [vmem:[%s1275_s30 + $0x3f8] sm:$0xff] }
  0x74   : > { %v266_v62 = vld [vmem:[%s1275_s30 + $0x400] sm:$0xff]  ;;  %770 = vst [vmem:[%s1285_s27 + $0x3c0] sm:$0xff] %v514_v51  ;;  %771 = vst [vmem:[%s1285_s27 + $0x3c8] sm:$0xff] %v515_v52  ;;  %v520_v63 = vmax.f32 %v264_v60, 0.0  ;;  %v521_v0 = vmax.f32 %v265_v61, 0.0  ;;  %v267_v2 = vld [vmem:[%s1275_s30 + $0x408] sm:$0xff] }
  0x75   : > { %772 = vst [vmem:[%s1285_s27 + $0x3d0] sm:$0xff] %v516_v53  ;;  %v522_v1 = vmax.f32 %v266_v62, 0.0  ;;  %v268_v3 = vld [vmem:[%s1275_s30 + $0x410] sm:$0xff]  ;;  %v269_v4 = vld [vmem:[%s1275_s30 + $0x418] sm:$0xff]  ;;  %773 = vst [vmem:[%s1285_s27 + $0x3d8] sm:$0xff] %v517_v57  ;;  %v523_v5 = vmax.f32 %v267_v2, 0.0 }
  0x76   : > { %774 = vst [vmem:[%s1285_s27 + $0x3e0] sm:$0xff] %v518_v58  ;;  %775 = vst [vmem:[%s1285_s27 + $0x3e8] sm:$0xff] %v519_v59  ;;  %v524_v6 = vmax.f32 %v268_v3, 0.0  ;;  %v525_v7 = vmax.f32 %v269_v4, 0.0  ;;  %v270_v8 = vld [vmem:[%s1275_s30 + $0x420] sm:$0xff]  ;;  %v271_v9 = vld [vmem:[%s1275_s30 + $0x428] sm:$0xff] }
  0x77   : > { %v272_v10 = vld [vmem:[%s1275_s30 + $0x430] sm:$0xff]  ;;  %776 = vst [vmem:[%s1285_s27 + $0x3f0] sm:$0xff] %v520_v63  ;;  %777 = vst [vmem:[%s1285_s27 + $0x3f8] sm:$0xff] %v521_v0  ;;  %v526_v11 = vmax.f32 %v270_v8, 0.0  ;;  %v527_v12 = vmax.f32 %v271_v9, 0.0  ;;  %v273_v14 = vld [vmem:[%s1275_s30 + $0x438] sm:$0xff] }
  0x78   : > { %778 = vst [vmem:[%s1285_s27 + $0x400] sm:$0xff] %v522_v1  ;;  %v528_v13 = vmax.f32 %v272_v10, 0.0  ;;  %v274_v15 = vld [vmem:[%s1275_s30 + $0x440] sm:$0xff]  ;;  %v275_v16 = vld [vmem:[%s1275_s30 + $0x448] sm:$0xff]  ;;  %779 = vst [vmem:[%s1285_s27 + $0x408] sm:$0xff] %v523_v5  ;;  %v529_v17 = vmax.f32 %v273_v14, 0.0 }
  0x79   : > { %780 = vst [vmem:[%s1285_s27 + $0x410] sm:$0xff] %v524_v6  ;;  %781 = vst [vmem:[%s1285_s27 + $0x418] sm:$0xff] %v525_v7  ;;  %v530_v18 = vmax.f32 %v274_v15, 0.0  ;;  %v531_v19 = vmax.f32 %v275_v16, 0.0  ;;  %v276_v20 = vld [vmem:[%s1275_s30 + $0x450] sm:$0xff]  ;;  %v277_v21 = vld [vmem:[%s1275_s30 + $0x458] sm:$0xff] }
  0x7a   : > { %v278_v22 = vld [vmem:[%s1275_s30 + $0x460] sm:$0xff]  ;;  %782 = vst [vmem:[%s1285_s27 + $0x420] sm:$0xff] %v526_v11  ;;  %783 = vst [vmem:[%s1285_s27 + $0x428] sm:$0xff] %v527_v12  ;;  %v532_v23 = vmax.f32 %v276_v20, 0.0  ;;  %v533_v24 = vmax.f32 %v277_v21, 0.0  ;;  %v279_v26 = vld [vmem:[%s1275_s30 + $0x468] sm:$0xff] }
  0x7b   : > { %784 = vst [vmem:[%s1285_s27 + $0x430] sm:$0xff] %v528_v13  ;;  %v534_v25 = vmax.f32 %v278_v22, 0.0  ;;  %v280_v27 = vld [vmem:[%s1275_s30 + $0x470] sm:$0xff]  ;;  %v281_v28 = vld [vmem:[%s1275_s30 + $0x478] sm:$0xff]  ;;  %785 = vst [vmem:[%s1285_s27 + $0x438] sm:$0xff] %v529_v17  ;;  %v535_v29 = vmax.f32 %v279_v26, 0.0 }
  0x7c   : > { %786 = vst [vmem:[%s1285_s27 + $0x440] sm:$0xff] %v530_v18  ;;  %787 = vst [vmem:[%s1285_s27 + $0x448] sm:$0xff] %v531_v19  ;;  %v536_v30 = vmax.f32 %v280_v27, 0.0  ;;  %v537_v31 = vmax.f32 %v281_v28, 0.0  ;;  %v282_v32 = vld [vmem:[%s1275_s30 + $0x480] sm:$0xff]  ;;  %v283_v33 = vld [vmem:[%s1275_s30 + $0x488] sm:$0xff] }
  0x7d   : > { %v284_v34 = vld [vmem:[%s1275_s30 + $0x490] sm:$0xff]  ;;  %788 = vst [vmem:[%s1285_s27 + $0x450] sm:$0xff] %v532_v23  ;;  %789 = vst [vmem:[%s1285_s27 + $0x458] sm:$0xff] %v533_v24  ;;  %v538_v35 = vmax.f32 %v282_v32, 0.0  ;;  %v539_v36 = vmax.f32 %v283_v33, 0.0  ;;  %v285_v38 = vld [vmem:[%s1275_s30 + $0x498] sm:$0xff] }
  0x7e   : > { %790 = vst [vmem:[%s1285_s27 + $0x460] sm:$0xff] %v534_v25  ;;  %v540_v37 = vmax.f32 %v284_v34, 0.0  ;;  %v286_v39 = vld [vmem:[%s1275_s30 + $0x4a0] sm:$0xff]  ;;  %v287_v40 = vld [vmem:[%s1275_s30 + $0x4a8] sm:$0xff]  ;;  %791 = vst [vmem:[%s1285_s27 + $0x468] sm:$0xff] %v535_v29  ;;  %v541_v41 = vmax.f32 %v285_v38, 0.0 }
  0x7f   : > { %792 = vst [vmem:[%s1285_s27 + $0x470] sm:$0xff] %v536_v30  ;;  %793 = vst [vmem:[%s1285_s27 + $0x478] sm:$0xff] %v537_v31  ;;  %v542_v42 = vmax.f32 %v286_v39, 0.0  ;;  %v543_v43 = vmax.f32 %v287_v40, 0.0  ;;  %v288_v44 = vld [vmem:[%s1275_s30 + $0x4b0] sm:$0xff]  ;;  %v289_v45 = vld [vmem:[%s1275_s30 + $0x4b8] sm:$0xff] }
  0x80   : > { %v290_v46 = vld [vmem:[%s1275_s30 + $0x4c0] sm:$0xff]  ;;  %794 = vst [vmem:[%s1285_s27 + $0x480] sm:$0xff] %v538_v35  ;;  %795 = vst [vmem:[%s1285_s27 + $0x488] sm:$0xff] %v539_v36  ;;  %v544_v47 = vmax.f32 %v288_v44, 0.0  ;;  %v545_v48 = vmax.f32 %v289_v45, 0.0  ;;  %v291_v50 = vld [vmem:[%s1275_s30 + $0x4c8] sm:$0xff] }
  0x81   : > { %796 = vst [vmem:[%s1285_s27 + $0x490] sm:$0xff] %v540_v37  ;;  %v546_v49 = vmax.f32 %v290_v46, 0.0  ;;  %v292_v51 = vld [vmem:[%s1275_s30 + $0x4d0] sm:$0xff]  ;;  %v293_v52 = vld [vmem:[%s1275_s30 + $0x4d8] sm:$0xff]  ;;  %797 = vst [vmem:[%s1285_s27 + $0x498] sm:$0xff] %v541_v41  ;;  %v547_v53 = vmax.f32 %v291_v50, 0.0 }
  0x82   : > { %798 = vst [vmem:[%s1285_s27 + $0x4a0] sm:$0xff] %v542_v42  ;;  %799 = vst [vmem:[%s1285_s27 + $0x4a8] sm:$0xff] %v543_v43  ;;  %v548_v54 = vmax.f32 %v292_v51, 0.0  ;;  %v549_v55 = vmax.f32 %v293_v52, 0.0  ;;  %v294_v56 = vld [vmem:[%s1275_s30 + $0x4e0] sm:$0xff]  ;;  %v295_v57 = vld [vmem:[%s1275_s30 + $0x4e8] sm:$0xff] }
  0x83   : > { %v296_v58 = vld [vmem:[%s1275_s30 + $0x4f0] sm:$0xff]  ;;  %800 = vst [vmem:[%s1285_s27 + $0x4b0] sm:$0xff] %v544_v47  ;;  %801 = vst [vmem:[%s1285_s27 + $0x4b8] sm:$0xff] %v545_v48  ;;  %v550_v59 = vmax.f32 %v294_v56, 0.0  ;;  %v551_v60 = vmax.f32 %v295_v57, 0.0  ;;  %v297_v62 = vld [vmem:[%s1275_s30 + $0x4f8] sm:$0xff] }
  0x84   : > { %802 = vst [vmem:[%s1285_s27 + $0x4c0] sm:$0xff] %v546_v49  ;;  %v552_v61 = vmax.f32 %v296_v58, 0.0  ;;  %v298_v63 = vld [vmem:[%s1275_s30 + $0x500] sm:$0xff]  ;;  %v299_v0 = vld [vmem:[%s1275_s30 + $0x508] sm:$0xff]  ;;  %803 = vst [vmem:[%s1285_s27 + $0x4c8] sm:$0xff] %v547_v53  ;;  %v553_v1 = vmax.f32 %v297_v62, 0.0 }
  0x85   : > { %804 = vst [vmem:[%s1285_s27 + $0x4d0] sm:$0xff] %v548_v54  ;;  %805 = vst [vmem:[%s1285_s27 + $0x4d8] sm:$0xff] %v549_v55  ;;  %v554_v2 = vmax.f32 %v298_v63, 0.0  ;;  %v555_v3 = vmax.f32 %v299_v0, 0.0  ;;  %v300_v4 = vld [vmem:[%s1275_s30 + $0x510] sm:$0xff]  ;;  %v301_v5 = vld [vmem:[%s1275_s30 + $0x518] sm:$0xff] }
  0x86   : > { %v302_v6 = vld [vmem:[%s1275_s30 + $0x520] sm:$0xff]  ;;  %806 = vst [vmem:[%s1285_s27 + $0x4e0] sm:$0xff] %v550_v59  ;;  %807 = vst [vmem:[%s1285_s27 + $0x4e8] sm:$0xff] %v551_v60  ;;  %v556_v7 = vmax.f32 %v300_v4, 0.0  ;;  %v557_v8 = vmax.f32 %v301_v5, 0.0  ;;  %v303_v10 = vld [vmem:[%s1275_s30 + $0x528] sm:$0xff] }
  0x87   : > { %808 = vst [vmem:[%s1285_s27 + $0x4f0] sm:$0xff] %v552_v61  ;;  %v558_v9 = vmax.f32 %v302_v6, 0.0  ;;  %v304_v11 = vld [vmem:[%s1275_s30 + $0x530] sm:$0xff]  ;;  %v305_v12 = vld [vmem:[%s1275_s30 + $0x538] sm:$0xff]  ;;  %809 = vst [vmem:[%s1285_s27 + $0x4f8] sm:$0xff] %v553_v1  ;;  %v559_v13 = vmax.f32 %v303_v10, 0.0 }
  0x88   : > { %810 = vst [vmem:[%s1285_s27 + $0x500] sm:$0xff] %v554_v2  ;;  %811 = vst [vmem:[%s1285_s27 + $0x508] sm:$0xff] %v555_v3  ;;  %v560_v14 = vmax.f32 %v304_v11, 0.0  ;;  %v561_v15 = vmax.f32 %v305_v12, 0.0  ;;  %v306_v16 = vld [vmem:[%s1275_s30 + $0x540] sm:$0xff]  ;;  %v307_v17 = vld [vmem:[%s1275_s30 + $0x548] sm:$0xff] }
  0x89   : > { %v308_v18 = vld [vmem:[%s1275_s30 + $0x550] sm:$0xff]  ;;  %812 = vst [vmem:[%s1285_s27 + $0x510] sm:$0xff] %v556_v7  ;;  %813 = vst [vmem:[%s1285_s27 + $0x518] sm:$0xff] %v557_v8  ;;  %v562_v19 = vmax.f32 %v306_v16, 0.0  ;;  %v563_v20 = vmax.f32 %v307_v17, 0.0  ;;  %v309_v22 = vld [vmem:[%s1275_s30 + $0x558] sm:$0xff] }
  0x8a   : > { %814 = vst [vmem:[%s1285_s27 + $0x520] sm:$0xff] %v558_v9  ;;  %v564_v21 = vmax.f32 %v308_v18, 0.0  ;;  %v310_v23 = vld [vmem:[%s1275_s30 + $0x560] sm:$0xff]  ;;  %v311_v24 = vld [vmem:[%s1275_s30 + $0x568] sm:$0xff]  ;;  %815 = vst [vmem:[%s1285_s27 + $0x528] sm:$0xff] %v559_v13  ;;  %v565_v25 = vmax.f32 %v309_v22, 0.0 }
  0x8b   : > { %816 = vst [vmem:[%s1285_s27 + $0x530] sm:$0xff] %v560_v14  ;;  %817 = vst [vmem:[%s1285_s27 + $0x538] sm:$0xff] %v561_v15  ;;  %v566_v26 = vmax.f32 %v310_v23, 0.0  ;;  %v567_v27 = vmax.f32 %v311_v24, 0.0  ;;  %v312_v28 = vld [vmem:[%s1275_s30 + $0x570] sm:$0xff]  ;;  %v313_v29 = vld [vmem:[%s1275_s30 + $0x578] sm:$0xff] }
  0x8c   : > { %v314_v30 = vld [vmem:[%s1275_s30 + $0x580] sm:$0xff]  ;;  %818 = vst [vmem:[%s1285_s27 + $0x540] sm:$0xff] %v562_v19  ;;  %819 = vst [vmem:[%s1285_s27 + $0x548] sm:$0xff] %v563_v20  ;;  %v568_v31 = vmax.f32 %v312_v28, 0.0  ;;  %v569_v32 = vmax.f32 %v313_v29, 0.0  ;;  %v315_v34 = vld [vmem:[%s1275_s30 + $0x588] sm:$0xff] }
  0x8d   : > { %820 = vst [vmem:[%s1285_s27 + $0x550] sm:$0xff] %v564_v21  ;;  %v570_v33 = vmax.f32 %v314_v30, 0.0  ;;  %v316_v35 = vld [vmem:[%s1275_s30 + $0x590] sm:$0xff]  ;;  %v317_v36 = vld [vmem:[%s1275_s30 + $0x598] sm:$0xff]  ;;  %821 = vst [vmem:[%s1285_s27 + $0x558] sm:$0xff] %v565_v25  ;;  %v571_v37 = vmax.f32 %v315_v34, 0.0 }
  0x8e   : > { %822 = vst [vmem:[%s1285_s27 + $0x560] sm:$0xff] %v566_v26  ;;  %823 = vst [vmem:[%s1285_s27 + $0x568] sm:$0xff] %v567_v27  ;;  %v572_v38 = vmax.f32 %v316_v35, 0.0  ;;  %v573_v39 = vmax.f32 %v317_v36, 0.0  ;;  %v318_v40 = vld [vmem:[%s1275_s30 + $0x5a0] sm:$0xff]  ;;  %v319_v41 = vld [vmem:[%s1275_s30 + $0x5a8] sm:$0xff] }
  0x8f   : > { %v320_v42 = vld [vmem:[%s1275_s30 + $0x5b0] sm:$0xff]  ;;  %824 = vst [vmem:[%s1285_s27 + $0x570] sm:$0xff] %v568_v31  ;;  %825 = vst [vmem:[%s1285_s27 + $0x578] sm:$0xff] %v569_v32  ;;  %v574_v43 = vmax.f32 %v318_v40, 0.0  ;;  %v575_v44 = vmax.f32 %v319_v41, 0.0  ;;  %v321_v46 = vld [vmem:[%s1275_s30 + $0x5b8] sm:$0xff] }
  0x90   : > { %826 = vst [vmem:[%s1285_s27 + $0x580] sm:$0xff] %v570_v33  ;;  %v576_v45 = vmax.f32 %v320_v42, 0.0  ;;  %v322_v47 = vld [vmem:[%s1275_s30 + $0x5c0] sm:$0xff]  ;;  %v323_v48 = vld [vmem:[%s1275_s30 + $0x5c8] sm:$0xff]  ;;  %827 = vst [vmem:[%s1285_s27 + $0x588] sm:$0xff] %v571_v37  ;;  %v577_v49 = vmax.f32 %v321_v46, 0.0 }
  0x91   : > { %828 = vst [vmem:[%s1285_s27 + $0x590] sm:$0xff] %v572_v38  ;;  %829 = vst [vmem:[%s1285_s27 + $0x598] sm:$0xff] %v573_v39  ;;  %v578_v50 = vmax.f32 %v322_v47, 0.0  ;;  %v579_v51 = vmax.f32 %v323_v48, 0.0  ;;  %v324_v52 = vld [vmem:[%s1275_s30 + $0x5d0] sm:$0xff]  ;;  %v325_v53 = vld [vmem:[%s1275_s30 + $0x5d8] sm:$0xff] }
  0x92   : > { %v326_v54 = vld [vmem:[%s1275_s30 + $0x5e0] sm:$0xff]  ;;  %830 = vst [vmem:[%s1285_s27 + $0x5a0] sm:$0xff] %v574_v43  ;;  %831 = vst [vmem:[%s1285_s27 + $0x5a8] sm:$0xff] %v575_v44  ;;  %v580_v55 = vmax.f32 %v324_v52, 0.0  ;;  %v581_v56 = vmax.f32 %v325_v53, 0.0  ;;  %v327_v58 = vld [vmem:[%s1275_s30 + $0x5e8] sm:$0xff] }
  0x93   : > { %832 = vst [vmem:[%s1285_s27 + $0x5b0] sm:$0xff] %v576_v45  ;;  %v582_v57 = vmax.f32 %v326_v54, 0.0  ;;  %v328_v59 = vld [vmem:[%s1275_s30 + $0x5f0] sm:$0xff]  ;;  %v329_v60 = vld [vmem:[%s1275_s30 + $0x5f8] sm:$0xff]  ;;  %833 = vst [vmem:[%s1285_s27 + $0x5b8] sm:$0xff] %v577_v49  ;;  %v583_v61 = vmax.f32 %v327_v58, 0.0 }
  0x94   : > { %834 = vst [vmem:[%s1285_s27 + $0x5c0] sm:$0xff] %v578_v50  ;;  %835 = vst [vmem:[%s1285_s27 + $0x5c8] sm:$0xff] %v579_v51  ;;  %v584_v62 = vmax.f32 %v328_v59, 0.0  ;;  %v585_v63 = vmax.f32 %v329_v60, 0.0  ;;  %v330_v0 = vld [vmem:[%s1275_s30 + $0x600] sm:$0xff]  ;;  %v331_v1 = vld [vmem:[%s1275_s30 + $0x608] sm:$0xff] }
  0x95   : > { %v332_v2 = vld [vmem:[%s1275_s30 + $0x610] sm:$0xff]  ;;  %836 = vst [vmem:[%s1285_s27 + $0x5d0] sm:$0xff] %v580_v55  ;;  %837 = vst [vmem:[%s1285_s27 + $0x5d8] sm:$0xff] %v581_v56  ;;  %v586_v3 = vmax.f32 %v330_v0, 0.0  ;;  %v587_v4 = vmax.f32 %v331_v1, 0.0  ;;  %v333_v6 = vld [vmem:[%s1275_s30 + $0x618] sm:$0xff] }
  0x96   : > { %838 = vst [vmem:[%s1285_s27 + $0x5e0] sm:$0xff] %v582_v57  ;;  %v588_v5 = vmax.f32 %v332_v2, 0.0  ;;  %v334_v7 = vld [vmem:[%s1275_s30 + $0x620] sm:$0xff]  ;;  %v335_v8 = vld [vmem:[%s1275_s30 + $0x628] sm:$0xff]  ;;  %839 = vst [vmem:[%s1285_s27 + $0x5e8] sm:$0xff] %v583_v61  ;;  %v589_v9 = vmax.f32 %v333_v6, 0.0 }
  0x97   : > { %840 = vst [vmem:[%s1285_s27 + $0x5f0] sm:$0xff] %v584_v62  ;;  %841 = vst [vmem:[%s1285_s27 + $0x5f8] sm:$0xff] %v585_v63  ;;  %v590_v10 = vmax.f32 %v334_v7, 0.0  ;;  %v591_v11 = vmax.f32 %v335_v8, 0.0  ;;  %v336_v12 = vld [vmem:[%s1275_s30 + $0x630] sm:$0xff]  ;;  %v337_v13 = vld [vmem:[%s1275_s30 + $0x638] sm:$0xff] }
  0x98   : > { %v338_v14 = vld [vmem:[%s1275_s30 + $0x640] sm:$0xff]  ;;  %842 = vst [vmem:[%s1285_s27 + $0x600] sm:$0xff] %v586_v3  ;;  %843 = vst [vmem:[%s1285_s27 + $0x608] sm:$0xff] %v587_v4  ;;  %v592_v15 = vmax.f32 %v336_v12, 0.0  ;;  %v593_v16 = vmax.f32 %v337_v13, 0.0  ;;  %v339_v18 = vld [vmem:[%s1275_s30 + $0x648] sm:$0xff] }
  0x99   : > { %844 = vst [vmem:[%s1285_s27 + $0x610] sm:$0xff] %v588_v5  ;;  %v594_v17 = vmax.f32 %v338_v14, 0.0  ;;  %v340_v19 = vld [vmem:[%s1275_s30 + $0x650] sm:$0xff]  ;;  %v341_v20 = vld [vmem:[%s1275_s30 + $0x658] sm:$0xff]  ;;  %845 = vst [vmem:[%s1285_s27 + $0x618] sm:$0xff] %v589_v9  ;;  %v595_v21 = vmax.f32 %v339_v18, 0.0 }
  0x9a   : > { %846 = vst [vmem:[%s1285_s27 + $0x620] sm:$0xff] %v590_v10  ;;  %847 = vst [vmem:[%s1285_s27 + $0x628] sm:$0xff] %v591_v11  ;;  %v596_v22 = vmax.f32 %v340_v19, 0.0  ;;  %v597_v23 = vmax.f32 %v341_v20, 0.0  ;;  %v342_v24 = vld [vmem:[%s1275_s30 + $0x660] sm:$0xff]  ;;  %v343_v25 = vld [vmem:[%s1275_s30 + $0x668] sm:$0xff] }
  0x9b   : > { %v344_v26 = vld [vmem:[%s1275_s30 + $0x670] sm:$0xff]  ;;  %848 = vst [vmem:[%s1285_s27 + $0x630] sm:$0xff] %v592_v15  ;;  %849 = vst [vmem:[%s1285_s27 + $0x638] sm:$0xff] %v593_v16  ;;  %v598_v27 = vmax.f32 %v342_v24, 0.0  ;;  %v599_v28 = vmax.f32 %v343_v25, 0.0  ;;  %v345_v30 = vld [vmem:[%s1275_s30 + $0x678] sm:$0xff] }
  0x9c   : > { %850 = vst [vmem:[%s1285_s27 + $0x640] sm:$0xff] %v594_v17  ;;  %v600_v29 = vmax.f32 %v344_v26, 0.0  ;;  %v346_v31 = vld [vmem:[%s1275_s30 + $0x680] sm:$0xff]  ;;  %v347_v32 = vld [vmem:[%s1275_s30 + $0x688] sm:$0xff]  ;;  %851 = vst [vmem:[%s1285_s27 + $0x648] sm:$0xff] %v595_v21  ;;  %v601_v33 = vmax.f32 %v345_v30, 0.0 }
  0x9d   : > { %852 = vst [vmem:[%s1285_s27 + $0x650] sm:$0xff] %v596_v22  ;;  %853 = vst [vmem:[%s1285_s27 + $0x658] sm:$0xff] %v597_v23  ;;  %v602_v34 = vmax.f32 %v346_v31, 0.0  ;;  %v603_v35 = vmax.f32 %v347_v32, 0.0  ;;  %v348_v36 = vld [vmem:[%s1275_s30 + $0x690] sm:$0xff]  ;;  %v349_v37 = vld [vmem:[%s1275_s30 + $0x698] sm:$0xff] }
  0x9e   : > { %v350_v38 = vld [vmem:[%s1275_s30 + $0x6a0] sm:$0xff]  ;;  %854 = vst [vmem:[%s1285_s27 + $0x660] sm:$0xff] %v598_v27  ;;  %855 = vst [vmem:[%s1285_s27 + $0x668] sm:$0xff] %v599_v28  ;;  %v604_v39 = vmax.f32 %v348_v36, 0.0  ;;  %v605_v40 = vmax.f32 %v349_v37, 0.0  ;;  %v351_v42 = vld [vmem:[%s1275_s30 + $0x6a8] sm:$0xff] }
  0x9f   : > { %856 = vst [vmem:[%s1285_s27 + $0x670] sm:$0xff] %v600_v29  ;;  %v606_v41 = vmax.f32 %v350_v38, 0.0  ;;  %v352_v43 = vld [vmem:[%s1275_s30 + $0x6b0] sm:$0xff]  ;;  %v353_v44 = vld [vmem:[%s1275_s30 + $0x6b8] sm:$0xff]  ;;  %857 = vst [vmem:[%s1285_s27 + $0x678] sm:$0xff] %v601_v33  ;;  %v607_v45 = vmax.f32 %v351_v42, 0.0 }
  0xa0   : > { %858 = vst [vmem:[%s1285_s27 + $0x680] sm:$0xff] %v602_v34  ;;  %859 = vst [vmem:[%s1285_s27 + $0x688] sm:$0xff] %v603_v35  ;;  %v608_v46 = vmax.f32 %v352_v43, 0.0  ;;  %v609_v47 = vmax.f32 %v353_v44, 0.0  ;;  %v354_v48 = vld [vmem:[%s1275_s30 + $0x6c0] sm:$0xff]  ;;  %v355_v49 = vld [vmem:[%s1275_s30 + $0x6c8] sm:$0xff] }
  0xa1   : > { %v356_v50 = vld [vmem:[%s1275_s30 + $0x6d0] sm:$0xff]  ;;  %860 = vst [vmem:[%s1285_s27 + $0x690] sm:$0xff] %v604_v39  ;;  %861 = vst [vmem:[%s1285_s27 + $0x698] sm:$0xff] %v605_v40  ;;  %v610_v51 = vmax.f32 %v354_v48, 0.0  ;;  %v611_v52 = vmax.f32 %v355_v49, 0.0  ;;  %v357_v54 = vld [vmem:[%s1275_s30 + $0x6d8] sm:$0xff] }
  0xa2   : > { %862 = vst [vmem:[%s1285_s27 + $0x6a0] sm:$0xff] %v606_v41  ;;  %v612_v53 = vmax.f32 %v356_v50, 0.0  ;;  %v358_v55 = vld [vmem:[%s1275_s30 + $0x6e0] sm:$0xff]  ;;  %v359_v56 = vld [vmem:[%s1275_s30 + $0x6e8] sm:$0xff]  ;;  %863 = vst [vmem:[%s1285_s27 + $0x6a8] sm:$0xff] %v607_v45  ;;  %v613_v57 = vmax.f32 %v357_v54, 0.0 }
  0xa3   : > { %864 = vst [vmem:[%s1285_s27 + $0x6b0] sm:$0xff] %v608_v46  ;;  %865 = vst [vmem:[%s1285_s27 + $0x6b8] sm:$0xff] %v609_v47  ;;  %v614_v58 = vmax.f32 %v358_v55, 0.0  ;;  %v615_v59 = vmax.f32 %v359_v56, 0.0  ;;  %v360_v60 = vld [vmem:[%s1275_s30 + $0x6f0] sm:$0xff]  ;;  %v361_v61 = vld [vmem:[%s1275_s30 + $0x6f8] sm:$0xff] }
  0xa4   : > { %v362_v62 = vld [vmem:[%s1275_s30 + $0x700] sm:$0xff]  ;;  %866 = vst [vmem:[%s1285_s27 + $0x6c0] sm:$0xff] %v610_v51  ;;  %867 = vst [vmem:[%s1285_s27 + $0x6c8] sm:$0xff] %v611_v52  ;;  %v616_v63 = vmax.f32 %v360_v60, 0.0  ;;  %v617_v0 = vmax.f32 %v361_v61, 0.0  ;;  %v363_v2 = vld [vmem:[%s1275_s30 + $0x708] sm:$0xff] }
  0xa5   : > { %868 = vst [vmem:[%s1285_s27 + $0x6d0] sm:$0xff] %v612_v53  ;;  %v618_v1 = vmax.f32 %v362_v62, 0.0  ;;  %v364_v3 = vld [vmem:[%s1275_s30 + $0x710] sm:$0xff]  ;;  %v365_v4 = vld [vmem:[%s1275_s30 + $0x718] sm:$0xff]  ;;  %869 = vst [vmem:[%s1285_s27 + $0x6d8] sm:$0xff] %v613_v57  ;;  %v619_v5 = vmax.f32 %v363_v2, 0.0 }
  0xa6   : > { %870 = vst [vmem:[%s1285_s27 + $0x6e0] sm:$0xff] %v614_v58  ;;  %871 = vst [vmem:[%s1285_s27 + $0x6e8] sm:$0xff] %v615_v59  ;;  %v620_v6 = vmax.f32 %v364_v3, 0.0  ;;  %v621_v7 = vmax.f32 %v365_v4, 0.0  ;;  %v366_v8 = vld [vmem:[%s1275_s30 + $0x720] sm:$0xff]  ;;  %v367_v9 = vld [vmem:[%s1275_s30 + $0x728] sm:$0xff] }
  0xa7   : > { %v368_v10 = vld [vmem:[%s1275_s30 + $0x730] sm:$0xff]  ;;  %872 = vst [vmem:[%s1285_s27 + $0x6f0] sm:$0xff] %v616_v63  ;;  %873 = vst [vmem:[%s1285_s27 + $0x6f8] sm:$0xff] %v617_v0  ;;  %v622_v11 = vmax.f32 %v366_v8, 0.0  ;;  %v623_v12 = vmax.f32 %v367_v9, 0.0  ;;  %v369_v14 = vld [vmem:[%s1275_s30 + $0x738] sm:$0xff] }
  0xa8   : > { %874 = vst [vmem:[%s1285_s27 + $0x700] sm:$0xff] %v618_v1  ;;  %v624_v13 = vmax.f32 %v368_v10, 0.0  ;;  %v370_v15 = vld [vmem:[%s1275_s30 + $0x740] sm:$0xff]  ;;  %v371_v16 = vld [vmem:[%s1275_s30 + $0x748] sm:$0xff]  ;;  %875 = vst [vmem:[%s1285_s27 + $0x708] sm:$0xff] %v619_v5  ;;  %v625_v17 = vmax.f32 %v369_v14, 0.0 }
  0xa9   : > { %876 = vst [vmem:[%s1285_s27 + $0x710] sm:$0xff] %v620_v6  ;;  %877 = vst [vmem:[%s1285_s27 + $0x718] sm:$0xff] %v621_v7  ;;  %v626_v18 = vmax.f32 %v370_v15, 0.0  ;;  %v627_v19 = vmax.f32 %v371_v16, 0.0  ;;  %v372_v20 = vld [vmem:[%s1275_s30 + $0x750] sm:$0xff]  ;;  %v373_v21 = vld [vmem:[%s1275_s30 + $0x758] sm:$0xff] }
  0xaa   : > { %v374_v22 = vld [vmem:[%s1275_s30 + $0x760] sm:$0xff]  ;;  %878 = vst [vmem:[%s1285_s27 + $0x720] sm:$0xff] %v622_v11  ;;  %879 = vst [vmem:[%s1285_s27 + $0x728] sm:$0xff] %v623_v12  ;;  %v628_v23 = vmax.f32 %v372_v20, 0.0  ;;  %v629_v24 = vmax.f32 %v373_v21, 0.0  ;;  %v375_v26 = vld [vmem:[%s1275_s30 + $0x768] sm:$0xff] }
  0xab   : > { %880 = vst [vmem:[%s1285_s27 + $0x730] sm:$0xff] %v624_v13  ;;  %v630_v25 = vmax.f32 %v374_v22, 0.0  ;;  %v376_v27 = vld [vmem:[%s1275_s30 + $0x770] sm:$0xff]  ;;  %v377_v28 = vld [vmem:[%s1275_s30 + $0x778] sm:$0xff]  ;;  %881 = vst [vmem:[%s1285_s27 + $0x738] sm:$0xff] %v625_v17  ;;  %v631_v29 = vmax.f32 %v375_v26, 0.0 }
  0xac   : > { %882 = vst [vmem:[%s1285_s27 + $0x740] sm:$0xff] %v626_v18  ;;  %883 = vst [vmem:[%s1285_s27 + $0x748] sm:$0xff] %v627_v19  ;;  %v632_v30 = vmax.f32 %v376_v27, 0.0  ;;  %v633_v31 = vmax.f32 %v377_v28, 0.0  ;;  %v378_v32 = vld [vmem:[%s1275_s30 + $0x780] sm:$0xff]  ;;  %v379_v33 = vld [vmem:[%s1275_s30 + $0x788] sm:$0xff] }
  0xad   : > { %v380_v34 = vld [vmem:[%s1275_s30 + $0x790] sm:$0xff]  ;;  %884 = vst [vmem:[%s1285_s27 + $0x750] sm:$0xff] %v628_v23  ;;  %885 = vst [vmem:[%s1285_s27 + $0x758] sm:$0xff] %v629_v24  ;;  %v634_v35 = vmax.f32 %v378_v32, 0.0  ;;  %v635_v36 = vmax.f32 %v379_v33, 0.0  ;;  %v381_v38 = vld [vmem:[%s1275_s30 + $0x798] sm:$0xff] }
  0xae   : > { %886 = vst [vmem:[%s1285_s27 + $0x760] sm:$0xff] %v630_v25  ;;  %v636_v37 = vmax.f32 %v380_v34, 0.0  ;;  %v382_v39 = vld [vmem:[%s1275_s30 + $0x7a0] sm:$0xff]  ;;  %v383_v40 = vld [vmem:[%s1275_s30 + $0x7a8] sm:$0xff]  ;;  %887 = vst [vmem:[%s1285_s27 + $0x768] sm:$0xff] %v631_v29  ;;  %v637_v41 = vmax.f32 %v381_v38, 0.0 }
  0xaf   : > { %888 = vst [vmem:[%s1285_s27 + $0x770] sm:$0xff] %v632_v30  ;;  %889 = vst [vmem:[%s1285_s27 + $0x778] sm:$0xff] %v633_v31  ;;  %v638_v42 = vmax.f32 %v382_v39, 0.0  ;;  %v639_v43 = vmax.f32 %v383_v40, 0.0  ;;  %v384_v44 = vld [vmem:[%s1275_s30 + $0x7b0] sm:$0xff]  ;;  %v385_v45 = vld [vmem:[%s1275_s30 + $0x7b8] sm:$0xff] }
  0xb0   : > { %v386_v46 = vld [vmem:[%s1275_s30 + $0x7c0] sm:$0xff]  ;;  %890 = vst [vmem:[%s1285_s27 + $0x780] sm:$0xff] %v634_v35  ;;  %891 = vst [vmem:[%s1285_s27 + $0x788] sm:$0xff] %v635_v36  ;;  %v640_v47 = vmax.f32 %v384_v44, 0.0  ;;  %v641_v48 = vmax.f32 %v385_v45, 0.0  ;;  %v387_v50 = vld [vmem:[%s1275_s30 + $0x7c8] sm:$0xff] }
  0xb1   : > { %892 = vst [vmem:[%s1285_s27 + $0x790] sm:$0xff] %v636_v37  ;;  %v642_v49 = vmax.f32 %v386_v46, 0.0  ;;  %v388_v51 = vld [vmem:[%s1275_s30 + $0x7d0] sm:$0xff]  ;;  %v389_v52 = vld [vmem:[%s1275_s30 + $0x7d8] sm:$0xff]  ;;  %893 = vst [vmem:[%s1285_s27 + $0x798] sm:$0xff] %v637_v41  ;;  %v643_v53 = vmax.f32 %v387_v50, 0.0 }
  0xb2   : > { %894 = vst [vmem:[%s1285_s27 + $0x7a0] sm:$0xff] %v638_v42  ;;  %895 = vst [vmem:[%s1285_s27 + $0x7a8] sm:$0xff] %v639_v43  ;;  %v644_v54 = vmax.f32 %v388_v51, 0.0  ;;  %v645_v55 = vmax.f32 %v389_v52, 0.0  ;;  %v390_v56 = vld [vmem:[%s1275_s30 + $0x7e0] sm:$0xff]  ;;  %v391_v57 = vld [vmem:[%s1275_s30 + $0x7e8] sm:$0xff] }
  0xb3   : > { %v392_v58 = vld [vmem:[%s1275_s30 + $0x7f0] sm:$0xff]  ;;  %896 = vst [vmem:[%s1285_s27 + $0x7b0] sm:$0xff] %v640_v47  ;;  %897 = vst [vmem:[%s1285_s27 + $0x7b8] sm:$0xff] %v641_v48  ;;  %v646_v59 = vmax.f32 %v390_v56, 0.0  ;;  %v647_v60 = vmax.f32 %v391_v57, 0.0  ;;  %v393_v62 = vld [vmem:[%s1275_s30 + $0x7f8] sm:$0xff] }
  0xb4   : > { %898 = vst [vmem:[%s1285_s27 + $0x7c0] sm:$0xff] %v642_v49  ;;  %v648_v61 = vmax.f32 %v392_v58, 0.0  ;;  %899 = vst [vmem:[%s1285_s27 + $0x7c8] sm:$0xff] %v643_v53  ;;  %v649_v63 = vmax.f32 %v393_v62, 0.0  ;;  %s907_s10 = scalar_lea.sflag [#allocation4], %s1271_s23  ;;  %s1092_s3 = scalar_lea.vmem %s1799_s17, 32768 }
  0xb5   : > { %900 = vst [vmem:[%s1285_s27 + $0x7d0] sm:$0xff] %v644_v54  ;;  %901 = vst [vmem:[%s1285_s27 + $0x7d8] sm:$0xff] %v645_v55  ;;  %p1093_p11 = scmp.ne.s32.totalorder %s1799_s17, %s1092_s3  ;;  %p1859_p12 = scmp.ne.s32.totalorder %s1855_s18, 0 }
  0xb6   : > { %902 = vst [vmem:[%s1285_s27 + $0x7e0] sm:$0xff] %v646_v59  ;;  %903 = vst [vmem:[%s1285_s27 + $0x7e8] sm:$0xff] %v647_v60  ;;  %s1161_s4 = smov [#allocation5]  }
  0xb7   : > { %904 = vst [vmem:[%s1285_s27 + $0x7f0] sm:$0xff] %v648_v61  ;;  %905 = vst [vmem:[%s1285_s27 + $0x7f8] sm:$0xff] %v649_v63  ;;  %p1094_p13 = pnand %p1093_p11, %p1859_p12  ;;  %s1096_s5 = sshll.u32 %s1161_s4, 4  ;;  %s1097_s5 = int_to_ptr.vmem [resolvable:$false] %s1096_s5 }
  0xb8   : > { %s1098_s11 = scalar_lea.vmem %s1097_s5, 65536  ;;  %p1099_p5 = scmp.lt.s32.totalorder %s1799_s17, %s1097_s5 }
  0xb9   : > { %p1095_p4 = pneg %p1094_p13  ;;  %p1100_p7 = scmp.lt.s32.totalorder %s1098_s11, %s1092_s3 }
  0xbb   : > { %p1101_p8 = por %p1100_p7, %p1099_p5 }
  0xbd   : > { %p1102_p10 = pnand %p1101_p8, %p1095_p4 }
  0xbf   : > { %1105 = shalt.err (!%p1102_p10)
}
  0xc0   : > { %s1106_s13 = scalar_lea.hbm %s1795_s2, 32768  ;;  %s1110_s20 = scalar_lea.hbm %s1850_s1, 65536 }
  0xc1   : > { %p1107_p0 = scmp.ne.s32.totalorder %s1795_s2, %s1106_s13  ;;  %p1111_p1 = scmp.lt.s32.totalorder %s1795_s2, %s1850_s1 }
  0xc2   : > { %p1112_p3 = scmp.lt.s32.totalorder %s1110_s20, %s1106_s13 }
  0xc3   : > { %p1108_p2 = pnand %p1107_p0, %p1859_p12 }
  0xc4   : > { %p1113_p6 = por %p1112_p3, %p1111_p1 }
  0xc5   : > { %p1109_p9 = pneg %p1108_p2 }
  0xc7   : > { %p1114_p11 = pnand %p1113_p6, %p1109_p9 }
  0xc9   : > { %1117 = shalt.err (!%p1114_p11)
}
  0xca   : > { %s1162_s24 = smov 512   ;;  %s1163_s26 = smov 32  }
  0xcb   : > { %1016 = dma.vmem_to_hbm [thread:$0]  (%p1859_p12), %s1799_s17, 32768, %s1795_s2, %s907_s10, %s1162_s24, %s1162_s24, %s1163_s26  }
  0xcc PF: > { %s936_s30 = sand.u32 1, %s1144_s6   ;;  %p1860_p13 = scmp.ne.s32.totalorder %s1856_s19, 0 }
  0xcd   : > { %p1861_p4 = scmp.ge.s32.totalorder %s1156_s9, 2  ;;  %s937_s25 = scalar_lea.sflag [#allocation4], %s936_s30 }
  0xcf   : > { %p1023_p5 = pnand %p1861_p4, %p1860_p13 }
  0xd1   : > { %p1024_p7 = pneg %p1023_p5 }
  0xd3   : > { %1139 = dma.done.wait (%p1024_p7), %s937_s25, 32768  }
  0xd4   : > { %1141 = vsyncadd (%p1024_p7), %s937_s25, 4294934528  ;;  %p14_p8 = scmp.ge.s32.totalorder %s1199_s12, 4   ;;  %s1862_s6 = smov %s1148_s7 }
  0xd5   : > { %s1863_s7 = smov %s1152_s8  ;;  %s1864_s8 = smov %s1211_s15 }
  0xd6   : > { %s1865_s9 = smov %s1199_s12  ;;  %16 = sbr.rel (!%p14_p8) target bundleno = 5 (0x5), region = 69 }
  0xdb   :  { %942 = vsyncpa [#allocation3], 1 }
  0xdc   :  { %944 = vsyncpa [#allocation3 + $0x1], 1 }
  0xdd   :  { %945 = vsyncpa [#allocation4], 1 }
  0xde   :  { %947 = vsyncpa [#allocation4 + $0x1], 1 }

</bundles_post_ra>
